<compile_context>
chip_gen: v7x
topology: tpu7x:2x2x1
jax: 0.10.0
libtpu: 0.0.40
codegen_flags: <defaults>
</compile_context>

<pallas_src>
import functools

import jax
import jax.numpy as jnp
from jax.experimental import pallas as pl
from jax.experimental.pallas import tpu as pltpu


def _round_up(x, m):
    return (x + m - 1) // m * m


# ---------------------------------------------------------------------------
# One-time hardware / feature probes (narrow and explicit; never wrapped
# around the real kernel's compile or execution).
# ---------------------------------------------------------------------------

@functools.lru_cache(maxsize=None)
def _vmem_capacity_bytes():
    """Per-core VMEM capacity; conservative 64 MiB (v7x) if unqueryable."""
    try:
        cap = int(getattr(pltpu.get_tpu_info(), "vmem_capacity_bytes", 0))
        if cap > 0:
            return cap
    except Exception:  # hardware query unavailable on this JAX build
        pass
    return 64 << 20


@functools.lru_cache(maxsize=None)
def _device_kind():
    try:
        return jax.devices()[0].device_kind.lower()
    except Exception:
        return ""


@functools.lru_cache(maxsize=None)
def _buffered_pipeline_supported():
    """Feature probe: does this JAX accept pipeline_mode=pl.Buffered(1) for a
    constant-index (resident) operand?  A tiny one-off copy kernel is compiled
    and run once; the real FFN pallas_call is NOT wrapped in try/except."""
    if not hasattr(pl, "Buffered"):
        return False

    def copy_kernel(x_ref, o_ref):
        o_ref[...] = x_ref[...]

    try:
        fn = pl.pallas_call(
            copy_kernel,
            out_shape=jax.ShapeDtypeStruct((16, 128), jnp.float32),
            grid=(2,),
            in_specs=[pl.BlockSpec((8, 128), lambda i: (0, 0),
                                   pipeline_mode=pl.Buffered(1))],
            out_specs=pl.BlockSpec((8, 128), lambda i: (i, 0)),
        )
        jax.block_until_ready(fn(jnp.zeros((8, 128), jnp.float32)))
        return True
    except Exception:
        return False


def _vmem_footprint(tm, tf, d_model_p, bpe_x, bpe_out, bpe_w, wbuf=2):
    """Rough per-core VMEM bytes for one pipelined FFN step."""
    return (
        2 * tm * d_model_p * bpe_x          # x row tile (double-buffered)
        + 2 * tm * d_model_p * bpe_out      # output row tile (double-buffered)
        + wbuf * d_model_p * tf * bpe_w     # W1 chunk
        + wbuf * tf * d_model_p * bpe_w     # W2 chunk
        + wbuf * tf * 4                     # b1 chunk (f32)
        + 2 * d_model_p * 4                 # b2 (f32)
        + tm * d_model_p * 4                # f32 accumulator scratch
        + tm * tf * (4 + bpe_w)             # live f32 h + narrowed h copy
    )


# ---------------------------------------------------------------------------
# Kernels
# ---------------------------------------------------------------------------

def _ffn_kernel_resident(x_ref, w1_ref, b1_ref, w2_ref, b2_ref, o_ref):
    # Whole d_ff resident: one fused pass, no accumulator scratch needed.
    x = x_ref[...].astype(w1_ref.dtype)            # in-vreg cast at MXU input
    h = jnp.dot(x, w1_ref[...], preferred_element_type=jnp.float32)
    h = jnp.maximum(h + b1_ref[...], 0.0)          # bias + ReLU in f32 (VPU)
    # TODO(synk): nn.Dropout is identity in eval mode; training-mode dropout
    # would use pltpu.prng_seed / pltpu.prng_random_bits seeded per grid step.
    h = h.astype(w2_ref.dtype)                     # narrow only at MXU input
    y = jnp.dot(h, w2_ref[...], preferred_element_type=jnp.float32)
    o_ref[...] = (y + b2_ref[...]).astype(o_ref.dtype)


def _ffn_kernel_tiled(x_ref, w1_ref, b1_ref, w2_ref, b2_ref, o_ref, acc_ref):
    # d_ff tiled: accumulate the partial second matmul into a f32 VMEM scratch.
    k = pl.program_id(1)

    @pl.when(k == 0)
    def _():
        acc_ref[...] = jnp.zeros_like(acc_ref)

    x = x_ref[...].astype(w1_ref.dtype)
    h = jnp.dot(x, w1_ref[...], preferred_element_type=jnp.float32)
    h = jnp.maximum(h + b1_ref[...], 0.0)
    # TODO(synk): dropout is identity in eval mode (see resident kernel).
    h = h.astype(w2_ref.dtype)
    acc_ref[...] += jnp.dot(h, w2_ref[...], preferred_element_type=jnp.float32)

    @pl.when(k == pl.num_programs(1) - 1)
    def _():
        o_ref[...] = (acc_ref[...] + b2_ref[...]).astype(o_ref.dtype)


# ---------------------------------------------------------------------------
# Wrapper
# ---------------------------------------------------------------------------

def prepare_ffn_params(w1, b1, w2, b2, *, mxu_dtype=jnp.bfloat16, _force_tf=None):
    """One-time (model-load) weight preparation.

    * Casts W1/W2 to the MXU feed dtype (default bf16; pass mxu_dtype=None to
      keep exact f32 numerics) ONCE -- no per-call astype/HBM passes.
    * Zero-pads d_model and d_ff to lane-dense multiples of 128, and d_ff
      further to a multiple of the chosen d_ff tile (zero columns/rows
      contribute exactly 0, so this is semantics-preserving).
    * Picks the d_ff tile `tf` and a row-tile cap from the queried VMEM
      capacity and chip generation, so the kernel fits v7x's 64 MiB per-core
      VMEM and uses v5e/v6e's 128 MiB, without any blind clamp.
    """
    d_model, d_ff = w1.shape
    assert w2.shape == (d_ff, d_model)
    assert b1.shape == (d_ff,) and b2.shape == (d_model,)

    wdt = jnp.dtype(mxu_dtype) if mxu_dtype is not None else jnp.dtype(w1.dtype)
    bpe_w = wdt.itemsize

    cap = _vmem_capacity_bytes()
    kind = _device_kind()

    # Generation-aware row-tile cap (always a multiple of 16 for bf16 packing):
    # 128-row granularity already fills v5e's 4x128 MXU (keep multiples of
    # 128); 256 feeds the 2x256 MXU on v6e/v7x; 512 is allowed on 128-MiB
    # parts to amortize the ~0.35us/step pipeline overhead.
    if "v5" in kind:
        tm_cap = 256
    elif cap >= (96 << 20):          # 128-MiB-VMEM parts (v6e class)
        tm_cap = 512
    else:                            # 64-MiB-VMEM parts (v7x class)
        tm_cap = 256

    d_model_p = _round_up(d_model, 128)
    budget = int(0.70 * cap)

    # d_ff tile: keep weights fully resident when they fit; otherwise chunk
    # d_ff (bounds weight VMEM and the live f32 intermediate h = (tm, tf)).
    if _force_tf is not None:
        tf = _round_up(int(_force_tf), 128)
    else:
        tf = _round_up(d_ff, 128)
        while (_vmem_footprint(tm_cap, tf, d_model_p, 4, 4, bpe_w) > budget
               and tf > 512):
            tf = max(512, _round_up(tf // 2, 128))
        while (_vmem_footprint(tm_cap, tf, d_model_p, 4, 4, bpe_w) > budget
               and tm_cap > 64):
            tm_cap //= 2

    d_ff_p = _round_up(_round_up(d_ff, 128), tf)

    w1_p = jnp.zeros((d_model_p, d_ff_p), wdt).at[:d_model, :d_ff].set(w1.astype(wdt))
    w2_p = jnp.zeros((d_ff_p, d_model_p), wdt).at[:d_ff, :d_model].set(w2.astype(wdt))
    b1_p = jnp.zeros((1, d_ff_p), jnp.float32).at[0, :d_ff].set(b1.astype(jnp.float32))
    b2_p = jnp.zeros((1, d_model_p), jnp.float32).at[0, :d_model].set(b2.astype(jnp.float32))

    return dict(w1=w1_p, b1=b1_p, w2=w2_p, b2=b2_p,
                d_model=d_model, d_ff=d_ff, d_model_p=d_model_p, d_ff_p=d_ff_p,
                tf=tf, tm_cap=tm_cap, vmem_cap=cap)


def feed_forward(x, params, *, tm=None):
    """Eval-mode FeedForward: linear_2(dropout(relu(linear_1(x)))), dropout=id.

    x: [..., d_model] in its native dtype; the cast to the MXU feed dtype
    happens in-vreg inside the kernel.
    """
    d_model, d_model_p = params["d_model"], params["d_model_p"]
    d_ff_p, tf = params["d_ff_p"], params["tf"]
    w1, b1, w2, b2 = params["w1"], params["b1"], params["w2"], params["b2"]
    cap = params["vmem_cap"]
    out_dtype = x.dtype

    orig_shape = x.shape
    assert orig_shape[-1] == d_model, "last dim must equal d_model"
    x2d = x.reshape(-1, d_model)
    M = x2d.shape[0]

    # Row tile: multiple of 16 (bf16 sublane pack), capped per generation.
    if tm is None:
        tm = min(params["tm_cap"], _round_up(M, 16))
    tm = max(16, _round_up(int(tm), 16))
    M_pad = _round_up(M, tm)

    # Zero-pad rows and lanes (lane-dense stores need d_model_p % 128 == 0);
    # x keeps its native dtype so it crosses HBM exactly once.
    if M_pad != M or d_model_p != d_model:
        x2d = jnp.pad(x2d, ((0, M_pad - M), (0, d_model_p - d_model)))

    grid_rows = M_pad // tm
    num_k = d_ff_p // tf
    bpe_x = jnp.dtype(x2d.dtype).itemsize
    bpe_out = jnp.dtype(out_dtype).itemsize
    bpe_w = jnp.dtype(w1.dtype).itemsize

    single_buf = (num_k == 1) and _buffered_pipeline_supported()
    # Size the VMEM limit from the real footprint (conservatively assuming
    # double-buffered weights), never above the queried per-core capacity.
    est = _vmem_footprint(tm, tf, d_model_p, bpe_x, bpe_out, bpe_w, wbuf=2)
    vmem_limit = int(min(cap, max(int(1.25 * est), 32 << 20)))

    weight_reads = 1 if num_k == 1 else grid_rows
    cost = pl.CostEstimate(
        flops=4 * M_pad * d_model_p * d_ff_p,           # 2 matmuls x 2 flop/MAC
        transcendentals=0,
        bytes_accessed=(M_pad * d_model_p * (bpe_x + bpe_out)
                        + weight_reads * 2 * d_model_p * d_ff_p * bpe_w
                        + (d_ff_p + d_model_p) * 4),
    )

    if num_k == 1:
        # Whole d_ff resident.  Constant index_map weights need one buffer
        # when the installed JAX supports Buffered(1) (feature-probed above).
        res_kw = dict(pipeline_mode=pl.Buffered(1)) if single_buf else {}
        grid = (grid_rows,)
        in_specs = [
            pl.BlockSpec((tm, d_model_p), lambda i: (i, 0)),
            pl.BlockSpec((d_model_p, d_ff_p), lambda i: (0, 0), **res_kw),
            pl.BlockSpec((1, d_ff_p), lambda i: (0, 0), **res_kw),
            pl.BlockSpec((d_ff_p, d_model_p), lambda i: (0, 0), **res_kw),
            pl.BlockSpec((1, d_model_p), lambda i: (0, 0), **res_kw),
        ]
        out_specs = pl.BlockSpec((tm, d_model_p), lambda i: (i, 0))
        kernel = _ffn_kernel_resident
        scratch_shapes = ()
        dims = ("parallel",)
    else:
        # d_ff tiled: ff axis last and "arbitrary"; accumulate into a f32 VMEM
        # scratch, init at k == 0, write back (+b2) at the last k.
        grid = (grid_rows, num_k)
        in_specs = [
            pl.BlockSpec((tm, d_model_p), lambda i, k: (i, 0)),
            pl.BlockSpec((d_model_p, tf), lambda i, k: (0, k)),
            pl.BlockSpec((1, tf), lambda i, k: (0, k)),
            pl.BlockSpec((tf, d_model_p), lambda i, k: (k, 0)),
            pl.BlockSpec((1, d_model_p), lambda i, k: (0, 0)),
        ]
        out_specs = pl.BlockSpec((tm, d_model_p), lambda i, k: (i, 0))
        kernel = _ffn_kernel_tiled
        scratch_shapes = (pltpu.VMEM((tm, d_model_p), jnp.float32),)
        dims = ("parallel", "arbitrary")

    out = pl.pallas_call(
        kernel,
        out_shape=jax.ShapeDtypeStruct((M_pad, d_model_p), out_dtype),
        grid_spec=pltpu.PrefetchScalarGridSpec(
            num_scalar_prefetch=0,
            grid=grid,
            in_specs=in_specs,
            out_specs=out_specs,
            scratch_shapes=scratch_shapes,
        ),
        compiler_params=pltpu.CompilerParams(
            dimension_semantics=dims,
            vmem_limit_bytes=vmem_limit,
        ),
        cost_estimate=cost,
    )(x2d, w1, b1, w2, b2)

    if M_pad != M or d_model_p != d_model:
        out = out[:M, :d_model]
    return out.reshape(orig_shape)


def _reference_ffn_f32(x, w1, b1, w2, b2):
    """Exact f32 reference (matches the PyTorch module in eval mode)."""
    h = jnp.dot(x, w1, precision=jax.lax.Precision.HIGHEST) + b1
    h = jnp.maximum(h, 0.0)
    return jnp.dot(h, w2, precision=jax.lax.Precision.HIGHEST) + b2


if __name__ == "__main__":
    d_model, d_ff = 128, 256

    key = jax.random.PRNGKey(0)
    kx, kw1, kb1, kw2, kb2, kx2 = jax.random.split(key, 6)

    # nn.Linear-style uniform init bounds.
    lim1 = 1.0 / (d_model ** 0.5)
    lim2 = 1.0 / (d_ff ** 0.5)
    w1 = jax.random.uniform(kw1, (d_model, d_ff), jnp.float32, -lim1, lim1)
    b1 = jax.random.uniform(kb1, (d_ff,), jnp.float32, -lim1, lim1)
    w2 = jax.random.uniform(kw2, (d_ff, d_model), jnp.float32, -lim2, lim2)
    b2 = jax.random.uniform(kb2, (d_model,), jnp.float32, -lim2, lim2)

    x = jax.random.normal(kx, (2, 8, d_model), dtype=jnp.float32)
    x_odd = jax.random.normal(kx2, (3, 7, d_model), dtype=jnp.float32)

    ref = _reference_ffn_f32(x.reshape(-1, d_model), w1, b1, w2, b2).reshape(x.shape)
    ref_odd = _reference_ffn_f32(
        x_odd.reshape(-1, d_model), w1, b1, w2, b2).reshape(x_odd.shape)

    # Case 1: default bf16 MXU feed, resident-weight path.  Compared against
    # the exact f32 reference so the bf16 drift is actually measured.
    params = prepare_ffn_params(w1, b1, w2, b2)        # once, at "model load"
    y = feed_forward(x, params)
    jax.block_until_ready(y)
    assert y.shape == x.shape
    assert jnp.allclose(y, ref, atol=3e-2, rtol=3e-2), "bf16 resident path mismatch"

    # Case 2: row count not divisible by the tile + forced d_ff tiling
    # (exercises the accumulator kernel and the padding path).
    params_tiled = prepare_ffn_params(w1, b1, w2, b2, _force_tf=128)
    y_odd = feed_forward(x_odd, params_tiled, tm=16)
    jax.block_until_ready(y_odd)
    assert y_odd.shape == x_odd.shape
    assert jnp.allclose(y_odd, ref_odd, atol=3e-2, rtol=3e-2), "bf16 tiled path mismatch"

    # Case 3: f32 feed (mxu_dtype=None).  Tolerance stays loose because the
    # TPU MXU may evaluate f32 matmuls via bf16 multi-pass.
    params_f32 = prepare_ffn_params(w1, b1, w2, b2, mxu_dtype=None)
    y_f32 = feed_forward(x, params_f32)
    jax.block_until_ready(y_f32)
    assert jnp.allclose(y_f32, ref, atol=2e-2, rtol=2e-2), "f32 path mismatch"

    print("KERNEL_OK")
</pallas_src>

<mosaic_0001>
module attributes {stable_mosaic.version = 11 : i64} {
  func.func @copy_kernel(%arg0: i32, %arg1: memref<8x128xf32, #tpu.memory_space<vmem>>, %arg2: memref<8x128xf32, #tpu.memory_space<vmem>>) attributes {dimension_semantics = [#tpu.dimension_semantics<arbitrary>], iteration_bounds = array<i64: 2>, scalar_prefetch = 0 : i64, scratch_operands = 0 : i64, tpu.core_type = #tpu.core_type<tc>, window_params = [{pipeline_mode = #tpu.pipeline_mode<synchronous>, transform_indices = @transform_0, window_bounds = array<i64: 8, 128>}, {transform_indices = @transform_1, window_bounds = array<i64: 8, 128>}]} {
    %c0 = arith.constant 0 : index
    %c0_0 = arith.constant 0 : index
    %0 = vector.load %arg1[%c0, %c0_0] : memref<8x128xf32, #tpu.memory_space<vmem>>, vector<8x128xf32>
    %c0_1 = arith.constant 0 : index
    %c0_2 = arith.constant 0 : index
    %1 = vector.load %arg2[%c0_1, %c0_2] : memref<8x128xf32, #tpu.memory_space<vmem>>, vector<8x128xf32>
    tpu.vector_store %arg2[%c0_1, %c0_2], %0 {strides = array<i32>} : memref<8x128xf32, #tpu.memory_space<vmem>>, vector<8x128xf32>,
    return
  }
  func.func @transform_0(%arg0: i32) -> (i32, i32) {
    %c0_i32 = arith.constant 0 : i32
    %c0_i32_0 = arith.constant 0 : i32
    %c0_i32_1 = arith.constant 0 : i32
    return %c0_i32, %c0_i32_0 : i32, i32
  }
  func.func @transform_1(%arg0: i32) -> (i32, i32) {
    %c0_i32 = arith.constant 0 : i32
    %c0_i32_0 = arith.constant 0 : i32
    return %arg0, %c0_i32 : i32, i32
  }
}

module attributes {stable_mosaic.version = 11 : i64} {
  func.func @_ffn_kernel_resident(%arg0: i32, %arg1: memref<16x128xf32, #tpu.memory_space<vmem>>, %arg2: memref<128x256xbf16, #tpu.memory_space<vmem>>, %arg3: memref<1x256xf32, #tpu.memory_space<vmem>>, %arg4: memref<256x128xbf16, #tpu.memory_space<vmem>>, %arg5: memref<1x128xf32, #tpu.memory_space<vmem>>, %arg6: memref<16x128xf32, #tpu.memory_space<vmem>>) attributes {dimension_semantics = [#tpu.dimension_semantics<parallel>], iteration_bounds = array<i64: 1>, scalar_prefetch = 0 : i64, scratch_operands = 0 : i64, tpu.core_type = #tpu.core_type<tc>, window_params = [{transform_indices = @transform_0, window_bounds = array<i64: 16, 128>}, {pipeline_mode = #tpu.pipeline_mode<synchronous>, transform_indices = @transform_1, window_bounds = array<i64: 128, 256>}, {pipeline_mode = #tpu.pipeline_mode<synchronous>, transform_indices = @transform_2, window_bounds = array<i64: 1, 256>}, {pipeline_mode = #tpu.pipeline_mode<synchronous>, transform_indices = @transform_3, window_bounds = array<i64: 256, 128>}, {pipeline_mode = #tpu.pipeline_mode<synchronous>, transform_indices = @transform_4, window_bounds = array<i64: 1, 128>}, {transform_indices = @transform_5, window_bounds = array<i64: 16, 128>}]} {
    %c0 = arith.constant 0 : index
    %c0_0 = arith.constant 0 : index
    %0 = vector.load %arg1[%c0, %c0_0] : memref<16x128xf32, #tpu.memory_space<vmem>>, vector<16x128xf32>
    %1 = arith.truncf %0 : vector<16x128xf32> to vector<16x128xbf16>
    %c0_1 = arith.constant 0 : index
    %c0_2 = arith.constant 0 : index
    %2 = vector.load %arg2[%c0_1, %c0_2] : memref<128x256xbf16, #tpu.memory_space<vmem>>, vector<128x256xbf16>
    %cst = arith.constant dense<0.000000e+00> : vector<16x256xf32>
    %3 = tpu.matmul %1, %2, %cst {dimension_numbers = #tpu.dot_dimension_numbers<[1], [0], [0], [1], [0, 0, 1, 1], [], []>} : vector<16x128xbf16>, vector<128x256xbf16>, vector<16x256xf32> -> vector<16x256xf32>
    %c0_3 = arith.constant 0 : index
    %c0_4 = arith.constant 0 : index
    %4 = vector.load %arg3[%c0_3, %c0_4] : memref<1x256xf32, #tpu.memory_space<vmem>>, vector<1x256xf32>
    %5 = vector.broadcast %4 : vector<1x256xf32> to vector<16x256xf32>
    %6 = arith.addf %3, %5 : vector<16x256xf32>
    %cst_5 = arith.constant 0.000000e+00 : f32
    %7 = vector.broadcast %cst_5 : f32 to vector<16x256xf32>
    %8 = arith.maximumf %6, %7 : vector<16x256xf32>
    %9 = arith.truncf %8 : vector<16x256xf32> to vector<16x256xbf16>
    %c0_6 = arith.constant 0 : index
    %c0_7 = arith.constant 0 : index
    %10 = vector.load %arg4[%c0_6, %c0_7] : memref<256x128xbf16, #tpu.memory_space<vmem>>, vector<256x128xbf16>
    %cst_8 = arith.constant dense<0.000000e+00> : vector<16x128xf32>
    %11 = tpu.matmul %9, %10, %cst_8 {dimension_numbers = #tpu.dot_dimension_numbers<[1], [0], [0], [1], [0, 0, 1, 1], [], []>} : vector<16x256xbf16>, vector<256x128xbf16>, vector<16x128xf32> -> vector<16x128xf32>
    %c0_9 = arith.constant 0 : index
    %c0_10 = arith.constant 0 : index
    %12 = vector.load %arg5[%c0_9, %c0_10] : memref<1x128xf32, #tpu.memory_space<vmem>>, vector<1x128xf32>
    %13 = vector.broadcast %12 : vector<1x128xf32> to vector<16x128xf32>
    %14 = arith.addf %11, %13 : vector<16x128xf32>
    %c0_11 = arith.constant 0 : index
    %c0_12 = arith.constant 0 : index
    %15 = vector.load %arg6[%c0_11, %c0_12] : memref<16x128xf32, #tpu.memory_space<vmem>>, vector<16x128xf32>
    tpu.vector_store %arg6[%c0_11, %c0_12], %14 {strides = array<i32>} : memref<16x128xf32, #tpu.memory_space<vmem>>, vector<16x128xf32>,
    return
  }
  func.func @transform_0(%arg0: i32) -> (i32, i32) {
    %c0_i32 = arith.constant 0 : i32
    %c0_i32_0 = arith.constant 0 : i32
    return %arg0, %c0_i32 : i32, i32
  }
  func.func @transform_1(%arg0: i32) -> (i32, i32) {
    %c0_i32 = arith.constant 0 : i32
    %c0_i32_0 = arith.constant 0 : i32
    %c0_i32_1 = arith.constant 0 : i32
    return %c0_i32, %c0_i32_0 : i32, i32
  }
  func.func @transform_2(%arg0: i32) -> (i32, i32) {
    %c0_i32 = arith.constant 0 : i32
    %c0_i32_0 = arith.constant 0 : i32
    %c0_i32_1 = arith.constant 0 : i32
    return %c0_i32, %c0_i32_0 : i32, i32
  }
  func.func @transform_3(%arg0: i32) -> (i32, i32) {
    %c0_i32 = arith.constant 0 : i32
    %c0_i32_0 = arith.constant 0 : i32
    %c0_i32_1 = arith.constant 0 : i32
    return %c0_i32, %c0_i32_0 : i32, i32
  }
  func.func @transform_4(%arg0: i32) -> (i32, i32) {
    %c0_i32 = arith.constant 0 : i32
    %c0_i32_0 = arith.constant 0 : i32
    %c0_i32_1 = arith.constant 0 : i32
    return %c0_i32, %c0_i32_0 : i32, i32
  }
  func.func @transform_5(%arg0: i32) -> (i32, i32) {
    %c0_i32 = arith.constant 0 : i32
    %c0_i32_0 = arith.constant 0 : i32
    return %arg0, %c0_i32 : i32, i32
  }
}

</mosaic_0001>

<bundles_post_ra>
// kernel: tpu_custom_call.1
= control target key start
LH: loop header
LB: loop body
LE: loop exit
PB: predicated region body
PF: predicated region fallthrough
CT: control target
= control target key end

     0   :  { %6 = vsyncpa [#allocation3], 0  ;;  %s481_s0 = inlined_call_operand.hbm [shape: f32[8,128], index: 0, kind: input, shape index: {}]   ;;  %s482_s1 = inlined_call_operand.hbm [shape: f32[16,128], index: 1, kind: output, shape index: {}]  }
   0x1   :  { %7 = vsyncpa [#allocation4], 0 }
   0x2   :  { %9 = vsyncpa [#allocation4 + $0x1], 0  ;;  %s351_s6 = smov 0   ;;  %s353_s7 = smov 0  }
   0x3   :  { %s355_s8 = smov 0   ;;  %s357_s9 = smov 0  }
   0x4 LB: > { %s372_s10 = sadd.s32 4294967295, %s337_s9   ;;  %s183_s11 = sadd.s32 4294967294, %s337_s9   ;;  %s337_s9 = sphi %s357_s9, %s498_s9   ;;  %s333_s8 = sphi %s355_s8, %s497_s8   ;;  %s329_s7 = sphi %s353_s7, %s496_s7   ;;  %s325_s6 = sphi %s351_s6, %s495_s6  }
   0x5   : > { %s376_s12 = sadd.s32 1, %s337_s9   ;;  %s43_s13 = sadd.s32 1, %s333_s8 }
   0x6   : > { %s40_s14 = ssub.s32 %s337_s9, %s376_s12  ;;  %p53_p0 = scmp.ne.s32.totalorder %s333_s8, %s329_s7 }
   0x7   : > { %p41_p1 = scmp.eq.s32.totalorder %s40_s14, 0  ;;  %p54_p2 = scmp.eq.s32.totalorder %s372_s10, 1 }
   0x8   : > { %p59_p3 = scmp.ne.s32.totalorder %s329_s7, %s325_s6  ;;  %p60_p4 = scmp.eq.s32.totalorder %s183_s11, 1 }
   0x9   : > { %s387_s15 = scalar_select %p41_p1, %s333_s8, %s43_s13  }
   0xa   : > { %p389_p5 = por %p54_p2, %p53_p0  ;;  %p393_p6 = por %p60_p4, %p59_p3 }
   0xb   : > { %p184_p7 = scmp.ge.s32.totalorder %s337_s9, 1  ;;  %p67_p8 = scmp.lt.s32.totalorder %s337_s9, 3 }
   0xc   : > { %s486_s16 = scalar_select %p389_p5, 1, 0 }
   0xd   : > { %s487_s17 = scalar_select %p393_p6, 1, 0 }
   0xe   : > { %p483_p9 = scmp.eq.s32.totalorder %s372_s10, 0  ;;  %p400_p10 = pnand %p184_p7, %p67_p8 }
   0xf   : > { %s339_s19 = smov [#allocation2]   ;;  %s243_s24 = scalar_lea.hbm %s481_s0, 128 }
  0x10   : > { %s488_s18 = scalar_select %p400_p10, 1, 0 }
  0x11   : > { %s80_s20 = sshll.u32 %s339_s19, 4  ;;  %p199_p11 = pneg %p400_p10  ;;  %s81_s20 = int_to_ptr.vmem [resolvable:$true] %s80_s20 }
  0x12   : > { %p244_p13 = scmp.ne.s32.totalorder %s481_s0, %s243_s24  ;;  %p250_p3 = scmp.lt.u32.totalorder %s243_s24, %s481_s0 }
  0x13   : > { %p408_p12 = pnand %p483_p9, %p199_p11 }
  0x15   : > { %p245_p0 = pneg %p408_p12 }
  0x17   : > { %p246_p1 = pnand %p245_p0, %p244_p13 }
  0x19   : > { %p247_p2 = pneg %p246_p1 }
  0x1b   : > { %p252_p4 = pnand %p250_p3, %p247_p2 }
  0x1d   : > { %255 = shalt.err (!%p252_p4)
}
  0x1e   : > { %s256_s29 = scalar_lea.vmem %s81_s20, 128  ;;  %p264_p9 = scmp.lt.s32.totalorder %s81_s20, %s81_s20 }
  0x1f   : > { %p257_p7 = scmp.ne.s32.totalorder %s81_s20, %s256_s29  ;;  %p265_p6 = scmp.lt.s32.totalorder %s256_s29, %s256_s29 }
  0x21   : > { %p259_p8 = pnand %p257_p7, %p245_p0  ;;  %p266_p5 = por %p265_p6, %p264_p9 }
  0x23   : > { %p260_p11 = pneg %p259_p8 }
  0x25   : > { %p267_p10 = pnand %p266_p5, %p260_p11 }
  0x27   : > { %270 = shalt.err (!%p267_p10)
}
  0x28   : > { %202 = dma.hbm_to_vmem [thread:$0]  (!%p408_p12), %s481_s0, 128, %s81_s20, [#allocation3]  }
  0x29   : > { %p490_p13 = scmp.ne.s32.totalorder %s488_s18, 0 }
  0x2a   : > { %p491_p1 = scmp.eq.s32.totalorder (!%p490_p13), %s372_s10, 0 }
  0x2b   : > { %93 = sbr.rel (%p490_p13) target bundleno = 77 (0x4d), region = 24 }
  0x32   : > { %316 = dma.done.wait (%p491_p1), [#allocation3], 128   ;;  %p492_p0 = pmov %p491_p1 }
  0x33   : > { %s105_s3 = sand.u32 1, %s329_s7   ;;  %s190_s13 = sshll.u32 %s372_s10, 7  ;;  %v108_v0 = vld [vmem:[#allocation2] sm:$0xff] }
  0x34   : > { %318 = vsyncadd (%p492_p0), [#allocation3], 4294967168  ;;  %s188_s4 = sshll.u32 %s105_s3, 3  ;;  %s441_s18 = scalar_lea.hbm %s482_s1, %s190_s13 }
  0x35   : > { %s107_s5 = scalar_lea.vmem [#allocation5], %s188_s4  ;;  %s111_s20 = scalar_lea.sflag [#allocation4], %s105_s3 }
  0x36   : > { %s124_s11 = sshll.u32 %s107_s5, 4  ;;  %109 = vst [vmem:[%s107_s5] sm:$0xff] %v108_v0  ;;  %p493_p6 = scmp.ne.s32.totalorder %s486_s16, 0  ;;  %s436_s11 = int_to_ptr.vmem [resolvable:$true] %s124_s11 }
  0x37   : > { %s271_s21 = scalar_lea.vmem %s436_s11, 128  ;;  %s340_s22 = smov [#allocation5]  }
  0x38   : > { %p272_p5 = scmp.ne.s32.totalorder %s436_s11, %s271_s21  ;;  %s275_s10 = sshll.u32 %s340_s22, 4  ;;  %s276_s10 = int_to_ptr.vmem [resolvable:$false] %s275_s10 }
  0x39   : > { %s277_s23 = scalar_lea.vmem %s276_s10, 256  ;;  %p278_p12 = scmp.lt.s32.totalorder %s436_s11, %s276_s10 }
  0x3a   : > { %p273_p9 = pnand %p272_p5, %p493_p6  ;;  %p279_p2 = scmp.lt.s32.totalorder %s277_s23, %s271_s21 }
  0x3c   : > { %p274_p10 = pneg %p273_p9  ;;  %p280_p3 = por %p279_p2, %p278_p12 }
  0x3e   : > { %p281_p4 = pnand %p280_p3, %p274_p10 }
  0x40   : > { %284 = shalt.err (!%p281_p4)
}
  0x41   : > { %s285_s24 = scalar_lea.hbm %s441_s18, 128  ;;  %s289_s27 = scalar_lea.hbm %s482_s1, 256 }
  0x42   : > { %p286_p7 = scmp.ne.s32.totalorder %s441_s18, %s285_s24  ;;  %p290_p13 = scmp.lt.u32.totalorder %s441_s18, %s482_s1 }
  0x43   : > { %p291_p1 = scmp.lt.u32.totalorder %s289_s27, %s285_s24  ;;  %p293_p5 = scmp.lt.u32.totalorder %s285_s24, %s441_s18 }
  0x44   : > { %p287_p8 = pnand %p286_p7, %p493_p6 }
  0x45   : > { %p292_p0 = por %p291_p1, %p290_p13 }
  0x46   : > { %p288_p11 = pneg %p287_p8 }
  0x47   : > { %p294_p9 = por %p293_p5, %p292_p0 }
  0x49   : > { %p295_p10 = pnand %p294_p9, %p288_p11 }
  0x4b   : > { %298 = shalt.err (!%p295_p10)
}
  0x4c   : > { %197 = dma.vmem_to_hbm [thread:$0]  (%p493_p6), %s436_s11, 128, %s441_s18, %s111_s20  }
  0x4d PF: > { %p209_p12 = scmp.ge.s32.totalorder %s337_s9, 2  ;;  %s136_s30 = sand.u32 1, %s325_s6  }
  0x4e   : > { %p494_p2 = scmp.ne.s32.totalorder %s487_s17, 0  ;;  %s137_s2 = scalar_lea.sflag [#allocation4], %s136_s30 }
  0x50   : > { %p204_p3 = pnand %p209_p12, %p494_p2 }
  0x52   : > { %320 = dma.done.wait (!%p204_p3), %s137_s2, 128  }
  0x53   : > { %322 = vsyncadd (!%p204_p3), %s137_s2, 4294967168  ;;  %p12_p4 = scmp.ge.s32.totalorder %s376_s12, 4   ;;  %s495_s6 = smov %s329_s7 }
  0x54   : > { %s496_s7 = smov %s333_s8  ;;  %s497_s8 = smov %s387_s15 }
  0x55   : > { %s498_s9 = smov %s376_s12  ;;  %14 = sbr.rel (!%p12_p4) target bundleno = 4 (0x4), region = 61 }
  0x5c   :  { %142 = vsyncpa [#allocation3], 1 }
  0x5d   :  { %144 = vsyncpa [#allocation3 + $0x1], 1 }
  0x5e   :  { %145 = vsyncpa [#allocation4], 1 }
  0x5f   :  { %147 = vsyncpa [#allocation4 + $0x1], 1 }

// kernel: tpu_custom_call.1
= control target key start
LH: loop header
LB: loop body
LE: loop exit
PB: predicated region body
PF: predicated region fallthrough
CT: control target
= control target key end

     0   :  { %10 = vsyncpa [#allocation3], 0  ;;  %s726_s0 = inlined_call_operand.hbm [shape: f32[16,128], index: 0, kind: input, shape index: {}]   ;;  %s727_s1 = inlined_call_operand.hbm [shape: bf16[128,256], index: 1, kind: input, shape index: {}]   ;;  %s728_s2 = inlined_call_operand.vmem [shape: f32[1,256], index: 2, kind: input, shape index: {}]   ;;  %s729_s3 = inlined_call_operand.hbm [shape: bf16[256,128], index: 3, kind: input, shape index: {}]   ;;  %s730_s4 = inlined_call_operand.vmem [shape: f32[1,128], index: 4, kind: input, shape index: {}]   ;;  %s731_s5 = inlined_call_operand.hbm [shape: f32[16,128], index: 5, kind: output, shape index: {}]  }
   0x1   :  { %11 = vsyncpa [#allocation6], 0 }
   0x2   :  { %12 = vsyncpa [#allocation4], 0  ;;  %s617_s18 = smov [#allocation5]   ;;  %s618_s20 = smov [#allocation2]  }
   0x3   :  { %s30_s19 = sshll.u32 %s617_s18, 4  ;;  %s18_s21 = sshll.u32 %s618_s20, 4  ;;  %s31_s19 = int_to_ptr.vmem [resolvable:$true] %s30_s19  ;;  %s656_s21 = int_to_ptr.vmem [resolvable:$true] %s18_s21 }
   0x4   :  { %s523_s24 = scalar_lea.hbm %s727_s1, 2048 }
   0x5   :  { %p524_p0 = scmp.ne.s32.totalorder %s727_s1, %s523_s24  ;;  %p527_p1 = scmp.lt.u32.totalorder %s523_s24, %s727_s1 }
   0x7   :  { %p529_p2 = pnand %p527_p1, %p524_p0 }
   0x9   :  { %532 = shalt.err (!%p529_p2)
}
   0xa   :  { %s533_s29 = scalar_lea.vmem %s31_s19, 2048  ;;  %p538_p4 = scmp.lt.s32.totalorder %s31_s19, %s31_s19 }
   0xb   :  { %p534_p3 = scmp.ne.s32.totalorder %s31_s19, %s533_s29  ;;  %p539_p5 = scmp.lt.s32.totalorder %s533_s29, %s533_s29 }
   0xd   :  { %p540_p6 = por %p539_p5, %p538_p4 }
   0xf   :  { %p541_p7 = pnand %p540_p6, %p534_p3 }
  0x11   :  { %544 = shalt.err (!%p541_p7)
}
  0x12   :  { %s619_s30 = smov 128   ;;  %s620_s6 = smov 8  }
  0x13   :  { %36 = dma.hbm_to_vmem [thread:$0]  %s727_s1, 2048, %s31_s19, [#allocation6], %s619_s30, %s619_s30, %s620_s6  }
  0x14   :  { %s545_s11 = scalar_lea.hbm %s726_s0, 256 }
  0x15   :  { %p546_p8 = scmp.ne.s32.totalorder %s726_s0, %s545_s11  ;;  %p549_p9 = scmp.lt.u32.totalorder %s545_s11, %s726_s0 }
  0x17   :  { %p551_p10 = pnand %p549_p9, %p546_p8 }
  0x19   :  { %554 = shalt.err (!%p551_p10)
}
  0x1a   :  { %s555_s16 = scalar_lea.vmem %s656_s21, 256  ;;  %p560_p12 = scmp.lt.s32.totalorder %s656_s21, %s656_s21 }
  0x1b   :  { %p556_p11 = scmp.ne.s32.totalorder %s656_s21, %s555_s16  ;;  %p561_p13 = scmp.lt.s32.totalorder %s555_s16, %s555_s16 }
  0x1d   :  { %p562_p0 = por %p561_p13, %p560_p12 }
  0x1f   :  { %p563_p1 = pnand %p562_p0, %p556_p11 }
  0x21   :  { %566 = shalt.err (!%p563_p1)
}
  0x22   :  { %24 = dma.hbm_to_vmem [thread:$0]  %s726_s0, 256, %s656_s21, [#allocation3], %s619_s30, %s619_s30, %s620_s6  }
  0x23   :  { %s621_s18 = smov [#allocation7]   ;;  %s567_s23 = scalar_lea.hbm %s729_s3, 2048 }
  0x24   :  { %s44_s19 = sshll.u32 %s621_s18, 4  ;;  %p568_p2 = scmp.ne.s32.totalorder %s729_s3, %s567_s23  ;;  %s45_s19 = int_to_ptr.vmem [resolvable:$true] %s44_s19 }
  0x25   :  { %p571_p3 = scmp.lt.u32.totalorder %s567_s23, %s729_s3 }
  0x27   :  { %p573_p4 = pnand %p571_p3, %p568_p2 }
  0x29   :  { %576 = shalt.err (!%p573_p4)
}
  0x2a   :  { %s577_s28 = scalar_lea.vmem %s45_s19, 2048  ;;  %p582_p6 = scmp.lt.s32.totalorder %s45_s19, %s45_s19 }
  0x2b   :  { %p578_p5 = scmp.ne.s32.totalorder %s45_s19, %s577_s28  ;;  %p583_p7 = scmp.lt.s32.totalorder %s577_s28, %s577_s28 }
  0x2d   :  { %p584_p8 = por %p583_p7, %p582_p6 }
  0x2f   :  { %p585_p9 = pnand %p584_p8, %p578_p5 }
  0x31   :  { %588 = shalt.err (!%p585_p9)
}
  0x32   :  { %s622_s0 = smov 64   ;;  %s623_s21 = smov 4  }
  0x33   :  { %50 = dma.hbm_to_vmem [thread:$0]  %s729_s3, 2048, %s45_s19, [#allocation6], %s622_s0, %s622_s0, %s623_s21  }
  0x34   :  { %611 = dma.done.wait [#allocation3], 256  }
  0x35   :  { %612 = vsyncadd [#allocation3], 4294967040 }
  0x36   :  { %613 = dma.done.wait [#allocation6], 4096  }
  0x37   :  { %614 = vsyncadd [#allocation6], 4294963200  ;;  %v624_v0 = vmov 0   ;;  %v483_v1 = vld [vmem:[#allocation5 + $0x4] ss:$8 sps:$4 sm:$0xff]   ;;  %v511_v16 = vld [vmem:[#allocation7 + $0x50] sm:$0xff]   ;;  %v84_v36 = vlaneseq }
  0x38   :  { %206 = vmatprep.mubr.bf16.mxu0 %v624_v0  ;;  %v485_v2 = vld [vmem:[#allocation5] ss:$8 sps:$4 sm:$0xff]   ;;  %174 = vmatprep.subr.bf16.mxu0 %v483_v1  ;;  %v486_v3 = vld [vmem:[#allocation5 + $0x14] ss:$8 sps:$4 sm:$0xff]   ;;  %v488_v4 = vld [vmem:[#allocation5 + $0x10] ss:$8 sps:$4 sm:$0xff]  }
  0x39   :  { %175 = vmatpush1.bf16.msra.mxu0 %v485_v2  ;;  %v489_v5 = vld [vmem:[#allocation5 + $0x24] ss:$8 sps:$4 sm:$0xff]   ;;  %v491_v6 = vld [vmem:[#allocation5 + $0x20] ss:$8 sps:$4 sm:$0xff]   ;;  %v492_v7 = vld [vmem:[#allocation5 + $0x34] ss:$8 sps:$4 sm:$0xff]  }
  0x3a   :  { %176 = vmatprep.subr.bf16.mxu0 %v486_v3  ;;  %v494_v8 = vld [vmem:[#allocation5 + $0x30] ss:$8 sps:$4 sm:$0xff]   ;;  %v495_v9 = vld [vmem:[#allocation5 + $0x44] ss:$8 sps:$4 sm:$0xff]   ;;  %v497_v11 = vld [vmem:[#allocation5 + $0x40] ss:$8 sps:$4 sm:$0xff]  }
  0x3b   :  { %v507_v10 = vld [vmem:[#allocation7 + $0x40] sm:$0xff]   ;;  %v498_v13 = vld [vmem:[#allocation5 + $0x54] ss:$8 sps:$4 sm:$0xff]   ;;  %v509_v14 = vld [vmem:[#allocation7 + $0x48] sm:$0xff]   ;;  %v85_v37 = vshrl.u32 %v84_v36, 7  ;;  %s625_s10 = smov [#allocation8]  }
  0x3c   :  { %v508_v12 = vld [vmem:[#allocation7] sm:$0xff]   ;;  %452 = vmatprep.subr.bf16.mxu1 %v507_v10  ;;  %v510_v15 = vld [vmem:[#allocation7 + $0x8] sm:$0xff]   ;;  %v500_v17 = vld [vmem:[#allocation5 + $0x50] ss:$8 sps:$4 sm:$0xff]   ;;  %s406_s11 = sshll.u32 %s625_s10, 4  ;;  %s407_s11 = int_to_ptr.vmem [resolvable:$true] %s406_s11 }
  0x3d   :  { %177 = vmatpush1.bf16.msra.mxu0 %v488_v4  ;;  %453 = vmatpush3.bf16.msra.mxu1 %v508_v12  ;;  %v501_v18 = vld [vmem:[#allocation5 + $0x64] ss:$8 sps:$4 sm:$0xff]   ;;  %v512_v19 = vld [vmem:[#allocation7 + $0x10] sm:$0xff]   ;;  %v513_v20 = vld [vmem:[#allocation7 + $0x58] sm:$0xff]   ;;  %v86_v38 = vsub.s32 0, %v85_v37  ;;  %v90_v40 = vsub.s32 1, %v85_v37  ;;  %p594_p11 = scmp.lt.s32.totalorder %s407_s11, %s407_s11 }
  0x3e   :  { %178 = vmatprep.subr.bf16.mxu0 %v489_v5  ;;  %454 = vmatprep.subr.bf16.mxu1 %v509_v14  ;;  %v503_v21 = vld [vmem:[#allocation5 + $0x60] ss:$8 sps:$4 sm:$0xff]   ;;  %v504_v22 = vld [vmem:[#allocation5 + $0x74] ss:$8 sps:$4 sm:$0xff]   ;;  %v506_v25 = vld [vmem:[#allocation5 + $0x70] ss:$8 sps:$4 sm:$0xff]  }
  0x3f   :  { %v514_v23 = vld [vmem:[#allocation7 + $0x18] sm:$0xff]   ;;  %v515_v24 = vld [vmem:[#allocation7 + $0x60] sm:$0xff]   ;;  %v63_v26 = vld [vmem:[#allocation2] sm:$0xff]  ;;  %s589_s12 = scalar_lea.vmem %s407_s11, 256 }
  0x40   :  { %v64_v27 = vld [vmem:[#allocation2 + $0x8] sm:$0xff]  ;;  %v516_v28 = vld [vmem:[#allocation7 + $0x20] sm:$0xff]   ;;  %v517_v29 = vld [vmem:[#allocation7 + $0x68] sm:$0xff]   ;;  %p590_p10 = scmp.ne.s32.totalorder %s407_s11, %s589_s12  ;;  %p595_p12 = scmp.lt.s32.totalorder %s589_s12, %s589_s12 }
  0x41   :  { %179 = vmatpush1.bf16.msra.mxu0 %v491_v6  ;;  %455 = vmatpush3.bf16.msra.mxu1 %v510_v15  ;;  %v65_v30 = vpack.c.bf16 %v64_v27, %v63_v26  ;;  %v518_v31 = vld [vmem:[#allocation7 + $0x28] sm:$0xff]   ;;  %v519_v32 = vld [vmem:[#allocation7 + $0x70] sm:$0xff]   ;;  %v521_v34 = vld [vmem:[#allocation7 + $0x78] sm:$0xff]  }
  0x42   :  { %180 = vmatprep.subr.bf16.mxu0 %v492_v7  ;;  %456 = vmatprep.subr.bf16.mxu1 %v511_v16  ;;  %v520_v33 = vld [vmem:[#allocation7 + $0x30] sm:$0xff]   ;;  %v522_v35 = vld [vmem:[#allocation7 + $0x38] sm:$0xff]   ;;  %p596_p13 = por %p595_p12, %p594_p11 }
  0x43   :  { %v82_v39 = vld [vmem:[%s728_s2] sm:$0x3] }
  0x44   :  { %v87_v41 = vrot.slane %v82_v39, %v86_v38  ;;  %v91_v42 = vrot.slane %v82_v39, %v90_v40  ;;  %v435_v58 = vld [vmem:[%s730_s4] ss:$0 sm:$0xff]  ;;  %p597_p0 = pnand %p596_p13, %p590_p10 }
  0x45   :  { %181 = vmatpush1.bf16.msra.mxu0 %v494_v8  ;;  %457 = vmatpush3.bf16.msra.mxu1 %v512_v19 }
  0x46   :  { %182 = vmatprep.subr.bf16.mxu0 %v495_v9  ;;  %458 = vmatprep.subr.bf16.mxu1 %v513_v20 }
  0x49   :  { %183 = vmatpush1.bf16.msra.mxu0 %v497_v11  ;;  %459 = vmatpush3.bf16.msra.mxu1 %v514_v23 }
  0x4a   :  { %184 = vmatprep.subr.bf16.mxu0 %v498_v13  ;;  %460 = vmatprep.subr.bf16.mxu1 %v515_v24 }
  0x4d   :  { %185 = vmatpush1.bf16.msra.mxu0 %v500_v17  ;;  %461 = vmatpush3.bf16.msra.mxu1 %v516_v28 }
  0x4e   :  { %186 = vmatprep.subr.bf16.mxu0 %v501_v18  ;;  %462 = vmatprep.subr.bf16.mxu1 %v517_v29 }
  0x51   :  { %187 = vmatpush1.bf16.msra.mxu0 %v503_v21  ;;  %463 = vmatpush3.bf16.msra.mxu1 %v518_v31 }
  0x52   :  { %188 = vmatprep.subr.bf16.mxu0 %v504_v22  ;;  %464 = vmatprep.subr.bf16.mxu1 %v519_v32 }
  0x55   :  { %189 = vmatpush1.bf16.msra.mxu0 %v506_v25  ;;  %465 = vmatpush3.bf16.msra.mxu1 %v520_v33 }
  0x56   :  { %466 = vmatprep.subr.bf16.mxu1 %v521_v34 }
  0x58   :  { %207 = vmatmul.mubr.bf16.vlgmr.msra.gmra.mrb[0].mxu0 %v65_v30 }
  0x59   :  { %467 = vmatpush3.bf16.msra.mxu1 %v522_v35 }
 0x12b   :  { %v208_v43 = vpop.f32.mrb[0].mxu0 }
 0x12c   :  { %v209_v44 = vadd.f32 %v208_v43, %v87_v41  ;;  %v210_v45 = vpop.f32.mrb[1].mxu0 }
 0x12d   :  { %v211_v46 = vadd.f32 %v210_v45, %v91_v42  ;;  %v212_v47 = vpop.f32.mrb[2].mxu0 }
 0x12e   :  { %v213_v48 = vadd.f32 %v212_v47, %v87_v41  ;;  %v214_v49 = vpop.f32.mrb[3].mxu0  ;;  %v217_v51 = vmax.f32 %v209_v44, 0.0 }
 0x12f   :  { %v215_v50 = vadd.f32 %v214_v49, %v91_v42  ;;  %v218_v53 = vmax.f32 %v211_v46, 0.0 }
 0x130   :  { %v219_v52 = vmax.f32 %v213_v48, 0.0 }
 0x131   :  { %v220_v54 = vmax.f32 %v215_v50, 0.0 }
 0x132   :  { %v221_v55 = vpack.c.bf16 %v219_v52, %v217_v51 }
 0x133   :  { %v222_v56 = vpack.c.bf16 %v220_v54, %v218_v53 }
 0x135   :  { %390 = vmatprep.mubr.bf16.mxu1 %v222_v56 }
 0x136   :  { %391 = vmatmul.mubr.bf16.vlgmr.msra.gmra.mrb[0].mxu1 %v221_v55 }
 0x209   :  { %v468_v57 = vpop.f32.mrb[0].mxu1 }
 0x20a   :  { %v469_v59 = vpop.f32.mrb[1].mxu1 }
 0x20b   :  { %v470_v60 = vadd.f32 %v469_v59, %v468_v57  ;;  %v471_v61 = vpop.f32.mrb[2].mxu1 }
 0x20c   :  { %v472_v62 = vpop.f32.mrb[3].mxu1 }
 0x20d   :  { %v393_v63 = vadd.f32 %v470_v60, %v435_v58  ;;  %v473_v0 = vadd.f32 %v472_v62, %v471_v61 }
 0x20f   :  { %399 = vst [vmem:[#allocation8] sm:$0xff] %v393_v63  ;;  %v396_v1 = vadd.f32 %v473_v0, %v435_v58 }
 0x211   :  { %400 = vst [vmem:[#allocation8 + $0x8] sm:$0xff] %v396_v1 }
 0x212   :  { %600 = shalt.err (!%p597_p0)
}
 0x213   :  { %s601_s14 = scalar_lea.hbm %s731_s5, 256 }
 0x214   :  { %p602_p1 = scmp.ne.s32.totalorder %s731_s5, %s601_s14  ;;  %p605_p2 = scmp.lt.u32.totalorder %s601_s14, %s731_s5 }
 0x216   :  { %p607_p3 = pnand %p605_p2, %p602_p1 }
 0x218   :  { %610 = shalt.err (!%p607_p3)
}
 0x219   :  { %412 = dma.vmem_to_hbm [thread:$0]  %s407_s11, 256, %s731_s5, [#allocation4], %s619_s30, %s619_s30, %s620_s6  }
 0x21a   :  { %615 = dma.done.wait [#allocation4], 256  }
 0x21b   :  { %616 = vsyncadd [#allocation4], 4294967040 }
 0x21c   :  { %416 = vsyncpa [#allocation3], 1 }
 0x21d   :  { %417 = vsyncpa [#allocation6], 1 }
 0x21e   :  { %418 = vsyncpa [#allocation4], 1 }

</bundles_post_ra>
